<compile_context>
chip_gen: v5e
topology: v5e:2x2
jax: 0.10.0
libtpu: 0.0.40
codegen_flags: <defaults>
</compile_context>

<pallas_src>
import functools
from typing import NamedTuple

import jax
import jax.numpy as jnp
from jax.experimental import pallas as pl
from jax.experimental.pallas import tpu as pltpu

_LANE = 128
_SUBLANE = 8


def _round_up(n: int, m: int) -> int:
    return ((n + m - 1) // m) * m


# ---------------------------------------------------------------------------
# Kernel
# ---------------------------------------------------------------------------
def dlinear_kernel(x_ref, w1_ref, w2_ref, b_ref, out_ref, *hid_refs, hp):
    # x_ref  : (BM, F)        rows for this grid step (incoming dtype, cast here)
    # w1_ref : (F, Hp)  bf16  fc1 weight, (in x out), lane-padded, VMEM-resident
    # w2_ref : (Hp, Op) bf16  fc2 weight, (in x out), lane-padded, VMEM-resident
    # b_ref  : (1, Hp+Op) f32 [b1_padded | b2_padded]
    # out_ref: (BM, Op) f32   final output (lane-dense; sliced to O in wrapper)
    # hid_refs (optional): ((BM, Hp) bf16,)  post-ReLU hidden (lane-dense bf16)
    x = x_ref[...].astype(w1_ref.dtype)                     # bf16 MXU operand
    h = jnp.dot(x, w1_ref[...], preferred_element_type=jnp.float32)
    h = jnp.maximum(h + b_ref[:, :hp], 0.0)                 # f32 VPU math (v5e-safe)
    if hid_refs:
        hid_refs[0][...] = h.astype(hid_refs[0].dtype)      # bf16 writeback (half bytes)
    out = jnp.dot(h.astype(w2_ref.dtype), w2_ref[...],
                  preferred_element_type=jnp.float32) + b_ref[:, hp:]
    out_ref[...] = out.astype(out_ref.dtype)


# ---------------------------------------------------------------------------
# One-time parameter preparation (hoisted out of the per-call path)
# ---------------------------------------------------------------------------
class DLinearParams(NamedTuple):
    w1: jax.Array          # (F, Hp)   bf16
    w2: jax.Array          # (Hp, Op)  bf16
    b: jax.Array           # (1, Hp+Op) f32
    in_features: int
    hidden_size: int
    output_size: int


def prepare_dlinear_params(w1, b1, w2, b2) -> DLinearParams:
    """w1:(H,F), b1:(H,), w2:(O,H), b2:(O,)  -- PyTorch nn.Linear layout.

    Transposes to (in, out), casts weights to bf16, and ZERO-pads the lane dims
    to 128 so kernel outputs are lane-dense while sliced results stay exact.
    """
    h, f = w1.shape
    o = w2.shape[0]
    hp = _round_up(h, _LANE)
    op = _round_up(o, _LANE)
    # TODO(synk): optionally lane-pad F as well (zero rows in w1 + pad x once) if
    # profiling ever shows masked vld on the x stream; skipped since it inflates
    # x HBM bytes 4x in this memory-bound regime.

    w1p = jnp.zeros((f, hp), jnp.bfloat16).at[:, :h].set(w1.T.astype(jnp.bfloat16))
    w2p = jnp.zeros((hp, op), jnp.bfloat16).at[:h, :o].set(w2.T.astype(jnp.bfloat16))
    b1p = jnp.zeros((1, hp), jnp.float32).at[0, :h].set(b1.astype(jnp.float32))
    b2p = jnp.zeros((1, op), jnp.float32).at[0, :o].set(b2.astype(jnp.float32))
    bcat = jnp.concatenate([b1p, b2p], axis=1)               # (1, Hp+Op)

    return DLinearParams(w1=jax.block_until_ready(w1p),
                         w2=jax.block_until_ready(w2p),
                         b=jax.block_until_ready(bcat),
                         in_features=f, hidden_size=h, output_size=o)


# ---------------------------------------------------------------------------
# pallas_call wrapper: gridded over the batch (row) dimension
# ---------------------------------------------------------------------------
@functools.partial(jax.jit, static_argnames=("hidden_size", "output_size",
                                             "return_hidden", "block_m"))
def dlinear_apply(x_batch, w1p, w2p, bcat, *, hidden_size, output_size,
                  return_hidden=True, block_m=512):
    """Batched forward: x_batch (B, F) -> out (B, O) [, hidden (B, H) bf16].

    block_m ~512 (multiple of 256 for v6e/v7x MXU, of 128 for v5e); per-block
    VMEM stays well under the 16/32 MiB scoped defaults on all generations.
    """
    b, f = x_batch.shape
    hp = w1p.shape[1]
    op = w2p.shape[1]

    bm = _round_up(min(block_m, _round_up(b, _SUBLANE)), _SUBLANE)
    bp = _round_up(b, bm)
    x = x_batch
    if bp != b:
        x = jnp.pad(x, ((0, bp - b), (0, 0)))                # zero rows, sliced off below
    grid = (bp // bm,)

    in_specs = [
        pl.BlockSpec((bm, f), lambda i: (i, 0)),              # streamed rows
        pl.BlockSpec((f, hp), lambda i: (0, 0)),              # weights: constant index
        pl.BlockSpec((hp, op), lambda i: (0, 0)),             #   -> VMEM-resident
        pl.BlockSpec((1, hp + op), lambda i: (0, 0)),
    ]
    out_spec = pl.BlockSpec((bm, op), lambda i: (i, 0))
    hid_spec = pl.BlockSpec((bm, hp), lambda i: (i, 0))

    if return_hidden:
        out_shape = (jax.ShapeDtypeStruct((bp, op), jnp.float32),
                     jax.ShapeDtypeStruct((bp, hp), jnp.bfloat16))
        out_specs = (out_spec, hid_spec)
    else:
        out_shape = jax.ShapeDtypeStruct((bp, op), jnp.float32)
        out_specs = out_spec

    # Advisory cost estimate with TRUE (unpadded) dims.
    flops = 2 * b * f * hidden_size + 2 * b * hidden_size * output_size
    bytes_accessed = (b * f * x_batch.dtype.itemsize
                      + w1p.size * 2 + w2p.size * 2 + bcat.size * 4
                      + b * output_size * 4
                      + (b * hidden_size * 2 if return_hidden else 0))

    result = pl.pallas_call(
        functools.partial(dlinear_kernel, hp=hp),
        grid=grid,
        in_specs=in_specs,
        out_specs=out_specs,
        out_shape=out_shape,
        compiler_params=pltpu.CompilerParams(
            dimension_semantics=("parallel",)),               # megacore-shardable rows
        cost_estimate=pl.CostEstimate(
            flops=flops, transcendentals=0, bytes_accessed=bytes_accessed),
    )(x, w1p, w2p, bcat)

    if return_hidden:
        out_p, hid_p = result
        return out_p[:b, :output_size], hid_p[:b, :hidden_size]
    return result[:b, :output_size]


def dlinear_forward(x, params: DLinearParams):
    """Exact nn.Module semantics: x.view(1,-1) -> fc1 -> relu -> fc2.

    Returns (output (1, output_size), hidden (1, hidden_size)).  Latency-bound;
    route high-throughput callers through dlinear_apply with many windows folded
    into the batch dimension instead of looping this."""
    assert x.size == params.in_features, (
        f"input has {x.size} elements, expected "
        f"window_size*input_size={params.in_features}")
    x_flat = x.reshape(1, params.in_features).astype(jnp.float32)
    out, hid = dlinear_apply(x_flat, params.w1, params.w2, params.b,
                             hidden_size=params.hidden_size,
                             output_size=params.output_size,
                             return_hidden=True, block_m=_SUBLANE)
    return out, hid.astype(jnp.float32)


# ---------------------------------------------------------------------------
# Self-test
# ---------------------------------------------------------------------------
if __name__ == "__main__":
    window_size = 8
    input_size = 4
    hidden_size = 32
    output_size = 4
    in_feat = window_size * input_size

    key = jax.random.PRNGKey(0)
    k_x, k_xb, k_w1, k_b1, k_w2, k_b2 = jax.random.split(key, 6)

    # PyTorch-default-style Linear init (uniform(-1/sqrt(fan_in), 1/sqrt(fan_in))).
    bound1 = 1.0 / jnp.sqrt(in_feat)
    bound2 = 1.0 / jnp.sqrt(hidden_size)
    w1 = jax.random.uniform(k_w1, (hidden_size, in_feat), jnp.float32, -bound1, bound1)
    b1 = jax.random.uniform(k_b1, (hidden_size,), jnp.float32, -bound1, bound1)
    w2 = jax.random.uniform(k_w2, (output_size, hidden_size), jnp.float32, -bound2, bound2)
    b2 = jax.random.uniform(k_b2, (output_size,), jnp.float32, -bound2, bound2)

    params = prepare_dlinear_params(w1, b1, w2, b2)
    TOL = dict(atol=5e-2, rtol=5e-2)    # bf16-operand tolerance (per review)

    # ---- single-window path (matches the PyTorch forward) ----
    x = jax.random.normal(k_x, (window_size, input_size), jnp.float32)
    out, hid = dlinear_forward(x, params)
    jax.block_until_ready((out, hid))

    x_flat = x.reshape(1, -1)
    h_ref = jnp.maximum(x_flat @ w1.T + b1, 0.0)
    out_ref = h_ref @ w2.T + b2
    assert out.shape == (1, output_size) and hid.shape == (1, hidden_size)
    assert jnp.allclose(hid, h_ref, **TOL), "hidden mismatch"
    assert jnp.allclose(out, out_ref, **TOL), "output mismatch"

    # ---- batched, gridded path (grid=3: exercises row padding + parallel axis) ----
    B = 300
    xb = jax.random.normal(k_xb, (B, window_size, input_size), jnp.float32)
    xb_flat = xb.reshape(B, -1)
    out_b, hid_b = dlinear_apply(xb_flat, params.w1, params.w2, params.b,
                                 hidden_size=hidden_size, output_size=output_size,
                                 return_hidden=True, block_m=128)
    jax.block_until_ready((out_b, hid_b))

    h_ref_b = jnp.maximum(xb_flat @ w1.T + b1, 0.0)
    out_ref_b = h_ref_b @ w2.T + b2
    assert jnp.allclose(hid_b.astype(jnp.float32), h_ref_b, **TOL), "batched hidden mismatch"
    assert jnp.allclose(out_b, out_ref_b, **TOL), "batched output mismatch"

    # ---- out-only path (drops the hid HBM write stream entirely) ----
    out_o = dlinear_apply(xb_flat, params.w1, params.w2, params.b,
                          hidden_size=hidden_size, output_size=output_size,
                          return_hidden=False, block_m=128)
    jax.block_until_ready(out_o)
    assert jnp.allclose(out_o, out_ref_b, **TOL), "out-only output mismatch"

    print("KERNEL_OK")
</pallas_src>

<mosaic_0001>
module attributes {stable_mosaic.version = 11 : i64} {
  func.func @dlinear_kernel(%arg0: i32, %arg1: memref<8x32xf32, #tpu.memory_space<vmem>>, %arg2: memref<32x128xbf16, #tpu.memory_space<vmem>>, %arg3: memref<128x128xbf16, #tpu.memory_space<vmem>>, %arg4: memref<1x256xf32, #tpu.memory_space<vmem>>, %arg5: memref<8x128xf32, #tpu.memory_space<vmem>>, %arg6: memref<8x128xbf16, #tpu.memory_space<vmem>>) attributes {dimension_semantics = [#tpu.dimension_semantics<parallel>], iteration_bounds = array<i64: 1>, scalar_prefetch = 0 : i64, scratch_operands = 0 : i64, tpu.core_type = #tpu.core_type<tc>, window_params = [{transform_indices = @transform_0, window_bounds = array<i64: 8, 32>}, {pipeline_mode = #tpu.pipeline_mode<synchronous>, transform_indices = @transform_1, window_bounds = array<i64: 32, 128>}, {pipeline_mode = #tpu.pipeline_mode<synchronous>, transform_indices = @transform_2, window_bounds = array<i64: 128, 128>}, {pipeline_mode = #tpu.pipeline_mode<synchronous>, transform_indices = @transform_3, window_bounds = array<i64: 1, 256>}, {transform_indices = @transform_4, window_bounds = array<i64: 8, 128>}, {transform_indices = @transform_5, window_bounds = array<i64: 8, 128>}]} {
    %c0 = arith.constant 0 : index
    %c0_0 = arith.constant 0 : index
    %0 = vector.load %arg1[%c0, %c0_0] : memref<8x32xf32, #tpu.memory_space<vmem>>, vector<8x32xf32>
    %1 = arith.truncf %0 : vector<8x32xf32> to vector<8x32xbf16>
    %c0_1 = arith.constant 0 : index
    %c0_2 = arith.constant 0 : index
    %2 = vector.load %arg2[%c0_1, %c0_2] : memref<32x128xbf16, #tpu.memory_space<vmem>>, vector<32x128xbf16>
    %cst = arith.constant dense<0.000000e+00> : vector<8x128xf32>
    %3 = tpu.matmul %1, %2, %cst {dimension_numbers = #tpu.dot_dimension_numbers<[1], [0], [0], [1], [0, 0, 1, 1], [], []>} : vector<8x32xbf16>, vector<32x128xbf16>, vector<8x128xf32> -> vector<8x128xf32>
    %c0_3 = arith.constant 0 : index
    %c0_4 = arith.constant 0 : index
    %4 = vector.load %arg4[%c0_3, %c0_4] : memref<1x256xf32, #tpu.memory_space<vmem>>, vector<1x128xf32>
    %5 = vector.broadcast %4 : vector<1x128xf32> to vector<8x128xf32>
    %6 = arith.addf %3, %5 : vector<8x128xf32>
    %cst_5 = arith.constant 0.000000e+00 : f32
    %7 = vector.broadcast %cst_5 : f32 to vector<8x128xf32>
    %8 = arith.maximumf %6, %7 : vector<8x128xf32>
    %9 = arith.truncf %8 : vector<8x128xf32> to vector<8x128xbf16>
    %c0_6 = arith.constant 0 : index
    %c0_7 = arith.constant 0 : index
    %10 = vector.load %arg6[%c0_6, %c0_7] : memref<8x128xbf16, #tpu.memory_space<vmem>>, vector<8x128xbf16>
    tpu.vector_store %arg6[%c0_6, %c0_7], %9 {strides = array<i32>} : memref<8x128xbf16, #tpu.memory_space<vmem>>, vector<8x128xbf16>,
    %11 = arith.truncf %8 : vector<8x128xf32> to vector<8x128xbf16>
    %c0_8 = arith.constant 0 : index
    %c0_9 = arith.constant 0 : index
    %12 = vector.load %arg3[%c0_8, %c0_9] : memref<128x128xbf16, #tpu.memory_space<vmem>>, vector<128x128xbf16>
    %cst_10 = arith.constant dense<0.000000e+00> : vector<8x128xf32>
    %13 = tpu.matmul %11, %12, %cst_10 {dimension_numbers = #tpu.dot_dimension_numbers<[1], [0], [0], [1], [0, 0, 1, 1], [], []>} : vector<8x128xbf16>, vector<128x128xbf16>, vector<8x128xf32> -> vector<8x128xf32>
    %c0_11 = arith.constant 0 : index
    %c128 = arith.constant 128 : index
    %14 = vector.load %arg4[%c0_11, %c128] : memref<1x256xf32, #tpu.memory_space<vmem>>, vector<1x128xf32>
    %15 = vector.broadcast %14 : vector<1x128xf32> to vector<8x128xf32>
    %16 = arith.addf %13, %15 : vector<8x128xf32>
    %c0_12 = arith.constant 0 : index
    %c0_13 = arith.constant 0 : index
    %17 = vector.load %arg5[%c0_12, %c0_13] : memref<8x128xf32, #tpu.memory_space<vmem>>, vector<8x128xf32>
    tpu.vector_store %arg5[%c0_12, %c0_13], %16 {strides = array<i32>} : memref<8x128xf32, #tpu.memory_space<vmem>>, vector<8x128xf32>,
    return
  }
  func.func @transform_0(%arg0: i32) -> (i32, i32) {
    %c0_i32 = arith.constant 0 : i32
    %c0_i32_0 = arith.constant 0 : i32
    return %arg0, %c0_i32 : i32, i32
  }
  func.func @transform_1(%arg0: i32) -> (i32, i32) {
    %c0_i32 = arith.constant 0 : i32
    %c0_i32_0 = arith.constant 0 : i32
    %c0_i32_1 = arith.constant 0 : i32
    return %c0_i32, %c0_i32_0 : i32, i32
  }
  func.func @transform_2(%arg0: i32) -> (i32, i32) {
    %c0_i32 = arith.constant 0 : i32
    %c0_i32_0 = arith.constant 0 : i32
    %c0_i32_1 = arith.constant 0 : i32
    return %c0_i32, %c0_i32_0 : i32, i32
  }
  func.func @transform_3(%arg0: i32) -> (i32, i32) {
    %c0_i32 = arith.constant 0 : i32
    %c0_i32_0 = arith.constant 0 : i32
    %c0_i32_1 = arith.constant 0 : i32
    return %c0_i32, %c0_i32_0 : i32, i32
  }
  func.func @transform_4(%arg0: i32) -> (i32, i32) {
    %c0_i32 = arith.constant 0 : i32
    %c0_i32_0 = arith.constant 0 : i32
    return %arg0, %c0_i32 : i32, i32
  }
  func.func @transform_5(%arg0: i32) -> (i32, i32) {
    %c0_i32 = arith.constant 0 : i32
    %c0_i32_0 = arith.constant 0 : i32
    return %arg0, %c0_i32 : i32, i32
  }
}

</mosaic_0001>

<bundles_post_ra>
// kernel: dlinear_apply.1
= control target key start
LH: loop header
LB: loop body
LE: loop exit
PB: predicated region body
PF: predicated region fallthrough
CT: control target
= control target key end

     0   :  { %11 = vsyncpa [#allocation3], 0  ;;  %s350_s0 = inlined_call_operand.vmem [shape: f32[8,32], index: 0, kind: input, shape index: {}]   ;;  %s351_s1 = inlined_call_operand.hbm [shape: bf16[32,128], index: 1, kind: input, shape index: {}]   ;;  %s352_s2 = inlined_call_operand.hbm [shape: bf16[128,128], index: 2, kind: input, shape index: {}]   ;;  %s353_s3 = inlined_call_operand.vmem [shape: f32[1,256], index: 3, kind: input, shape index: {}]   ;;  %s354_s4 = inlined_call_operand.vmem [shape: f32[8,128], index: 4, kind: output, shape index: {0}]   ;;  %s355_s5 = inlined_call_operand.vmem [shape: bf16[8,128], index: 5, kind: output, shape index: {1}]  }
   0x1   :  { %s19_s20 = sshll.u32 %s351_s1, 4  ;;  %s20_s20 = int_to_ptr.hbm [resolvable:$true] %s19_s20 }
   0x2   :  { %12 = vsyncpa [#allocation5], 0  ;;  %s295_s21 = smov [#allocation2]   ;;  %s32_s25 = sshll.u32 %s352_s2, 4  ;;  %s33_s25 = int_to_ptr.hbm [resolvable:$true] %s32_s25 }
   0x3   :  { %s21_s22 = sshll.u32 %s295_s21, 4  ;;  %s296_s26 = smov 64   ;;  %s22_s22 = int_to_ptr.vmem [resolvable:$true] %s21_s22 }
   0x4   :  { %s297_s27 = smov 4   ;;  %s298_s28 = smov [#allocation4]  }
   0x5   :  { %27 = dma.hbm_to_vmem [thread:$0]  %s20_s20, 256, %s22_s22, [#allocation3], %s296_s26, %s296_s26, %s297_s27  }
   0x6   :  { %s34_s29 = sshll.u32 %s298_s28, 4  ;;  %s35_s29 = int_to_ptr.vmem [resolvable:$true] %s34_s29 }
   0x7   :  { %40 = dma.hbm_to_vmem [thread:$0]  %s33_s25, 1024, %s35_s29, [#allocation5], %s296_s26, %s296_s26, %s297_s27  }
   0x8   :  { %291 = dma.done.wait [#allocation3], 256  }
   0x9   :  { %292 = vsyncadd [#allocation3], 4294967040 }
   0xa   :  { %293 = dma.done.wait [#allocation5], 1024  }
   0xb   :  { %294 = vsyncadd [#allocation5], 4294966272  ;;  %v228_v0 = vld [vmem:[#allocation2 + $0x8] sm:$0xff]  ;;  %v227_v2 = vld [vmem:[#allocation2] sm:$0xff]  ;;  %vm74_vm0 = vcmask 261120  }
   0xc   :  { %v236_v1 = vld [vmem:[#allocation4 + $0x38] sm:$0xff]  ;;  %84 = vmatpush.bf16.msra.mxu0 %v228_v0  ;;  %v52_v3 = vld [vmem:[%s350_s0] sm:$0xff]  ;;  %v234_v6 = vld [vmem:[#allocation4 + $0x28] sm:$0xff] }
   0xd   :  { %162 = vmatpush.bf16.msra.mxu1 %v236_v1  ;;  %v235_v4 = vld [vmem:[#allocation4 + $0x30] sm:$0xff]  ;;  %v53_v5 = vpack.c.bf16 %v52_v3, %v52_v3  ;;  %v233_v7 = vld [vmem:[#allocation4 + $0x20] sm:$0xff]  ;;  %v232_v8 = vld [vmem:[#allocation4 + $0x18] sm:$0xff] }
   0xe   :  { %v231_v9 = vld [vmem:[#allocation4 + $0x10] sm:$0xff]  ;;  %v230_v10 = vld [vmem:[#allocation4 + $0x8] sm:$0xff]  ;;  %v229_v11 = vld [vmem:[#allocation4] sm:$0xff] }
   0xf   :  { %v241_v12 = vld [vmem:[%s353_s3] ss:$0 sm:$0xff]  ;;  %v242_v18 = vld [vmem:[%s353_s3 + $0x1] ss:$0 sm:$0xff] }
  0x10   :  { %85 = vmatpush.bf16.msra.mxu0 %v227_v2 }
  0x11   :  { %163 = vmatpush.bf16.msra.mxu1 %v235_v4 }
  0x13   :  { %194 = vmatmul.msk.bf16.vlgmr.msra.gmra.mxu0 %vm74_vm0, %v53_v5 }
  0x15   :  { %164 = vmatpush.bf16.msra.mxu1 %v234_v6 }
  0x19   :  { %165 = vmatpush.bf16.msra.mxu1 %v233_v7 }
  0x1d   :  { %166 = vmatpush.bf16.msra.mxu1 %v232_v8 }
  0x21   :  { %167 = vmatpush.bf16.msra.mxu1 %v231_v9 }
  0x25   :  { %168 = vmatpush.bf16.msra.mxu1 %v230_v10 }
  0x29   :  { %169 = vmatpush.bf16.msra.mxu1 %v229_v11 }
  0x90   :  { %v87_v13 = vpop.f32.mrf.mxu0 }
  0x91   :  { %v88_v14 = vadd.f32 %v241_v12, %v87_v13 }
  0x93   :  { %v91_v15 = vmax.f32 %v88_v14, 0.0 }
  0x95   :  { %v92_v16 = vpack.c.bf16 %v91_v15, %v91_v15 }
  0x97   :  { %93 = vst [vmem:[%s355_s5] sm:$0xf] %v92_v16  ;;  %170 = vmatmul.bf16.vlgmr.msra.gmra.mxu1 %v92_v16 }
  0x98   :  { %v89_v17 = vpop.f32.mrf.mxu0 }
 0x114   :  { %v171_v19 = vpop.f32.mrf.mxu1 }
 0x115   :  { %v172_v20 = vadd.f32 %v242_v18, %v171_v19 }
 0x117   :  { %175 = vst [vmem:[%s354_s4] sm:$0xff] %v172_v20 }
 0x11c   :  { %v173_v21 = vpop.f32.mrf.mxu1 }
 0x11d   :  { %184 = vsyncpa [#allocation3], 1 }
 0x11e   :  { %185 = vsyncpa [#allocation5], 1 }

</bundles_post_ra>
